<compile_context>
chip_gen: v7x
topology: tpu7x:2x2x1
jax: 0.10.0
libtpu: 0.0.40
codegen_flags: <defaults>
</compile_context>

<pallas_src>
import functools

import numpy as np
import jax
import jax.numpy as jnp
from jax.experimental import pallas as pl
from jax.experimental.pallas import tpu as pltpu  # noqa: F401  (no TPU-specific params needed at this size)


# --------------------------------------------------------------------------------------
# deterministic parameter init (same shapes / fan-in as the PyTorch module __init__)
# --------------------------------------------------------------------------------------
def init_raw_params(key, hidden_dims):
    ks = jax.random.split(key, 4)
    fan_in = hidden_dims * 3  # Conv1d(hidden, 4*hidden, K=3) default init bound

    def u(k, shape):
        b = 1.0 / np.sqrt(fan_in)
        return jax.random.uniform(k, shape, jnp.float32, -b, b)

    return {
        "wi": u(ks[0], (4 * hidden_dims, hidden_dims, 3)),  # MaskedConv1d(hidden, 4h, 3, mask='B')
        "bi": u(ks[1], (4 * hidden_dims,)),
        "ws": u(ks[2], (4 * hidden_dims, hidden_dims, 3)),  # Conv1d(channel_in==hidden, 4h, 3)
        "bs": u(ks[3], (4 * hidden_dims,)),
    }


# --------------------------------------------------------------------------------------
# rewrite the two K=3 convs as one tap-concatenated, channel-last weight matrix
#   rows: [ x@(w-1) | x@(w) | h@(w-1) | h@(w) | h@(w+1) ]
#   (MaskedConv1d mask 'B', K=3 zeroes tap index 2, so the x@(w+1) tap is dropped entirely)
# --------------------------------------------------------------------------------------
def build_kernel_params(raw):
    wi = np.asarray(raw["wi"], np.float32).copy()
    wi[:, :, 2:] = 0.0                              # mask 'B': self.mask[:, :, K//2 + 1:] = 0
    ws = np.asarray(raw["ws"], np.float32)
    H = wi.shape[1]

    w_cat = np.zeros((5 * H, 4 * H), np.float32)
    w_cat[0 * H:1 * H] = wi[:, :, 0].T              # input, tap w-1
    w_cat[1 * H:2 * H] = wi[:, :, 1].T              # input, tap w
    w_cat[2 * H:3 * H] = ws[:, :, 0].T              # state, tap w-1
    w_cat[3 * H:4 * H] = ws[:, :, 1].T              # state, tap w
    w_cat[4 * H:5 * H] = ws[:, :, 2].T              # state, tap w+1

    bias = (np.asarray(raw["bi"], np.float32) + np.asarray(raw["bs"], np.float32))[None, :]
    return {
        "w_cat": jnp.asarray(w_cat, jnp.bfloat16),  # bf16 weights, f32 accumulation
        "bias": jnp.asarray(bias, jnp.float32),     # (1, 4H)
    }


# --------------------------------------------------------------------------------------
# Pallas kernel: one MXU matmul + sigmoid + LSTM elementwise update, fully fused
# --------------------------------------------------------------------------------------
def rowlstm_cell_kernel(xcat_ref, w_ref, b_ref, cprev_ref, h_ref, c_ref):
    # xcat: (N*W, 5C) bf16 | w: (5C, 4C) bf16 | b: (1, 4C) f32 | cprev: (N*W, C) f32
    gates = jnp.dot(xcat_ref[...], w_ref[...], preferred_element_type=jnp.float32)
    gates = jax.nn.sigmoid(gates + b_ref[...])   # torch applies sigmoid to ALL gates (incl. g)

    C = cprev_ref.shape[1]
    i = gates[:, 0 * C:1 * C]
    g = gates[:, 1 * C:2 * C]
    f = gates[:, 2 * C:3 * C]
    o = gates[:, 3 * C:4 * C]

    c = f * cprev_ref[...] + i * g
    c_ref[...] = c
    h_ref[...] = o * jnp.tanh(c)


# --------------------------------------------------------------------------------------
# wrapper: matches RowLSTMCell.forward(inputs, states) -> (h, (c, h))
#   inputs / c_prev / h_prev: (N, hidden_dims * image_size), torch flat index = c*W + w
# --------------------------------------------------------------------------------------
def rowlstm_cell_forward(params, inputs, states, *, hidden_dims, image_size):
    C, W = hidden_dims, image_size
    c_prev, h_prev = states
    N = inputs.shape[0]

    def to_cl(v):                       # torch-flat (N, C*W) -> channel-last (N, W, C)
        return v.reshape(N, C, W).transpose(0, 2, 1)

    x_cl, h_cl, c_cl = to_cl(inputs), to_cl(h_prev), to_cl(c_prev)

    zrow = jnp.zeros((N, 1, C), jnp.float32)
    x_m1 = jnp.concatenate([zrow, x_cl[:, :W - 1, :]], axis=1)   # x at w-1 (zero-padded)
    h_m1 = jnp.concatenate([zrow, h_cl[:, :W - 1, :]], axis=1)   # h at w-1
    h_p1 = jnp.concatenate([h_cl[:, 1:, :], zrow], axis=1)       # h at w+1

    xcat = jnp.concatenate([x_m1, x_cl, h_m1, h_cl, h_p1], axis=-1)
    xcat = xcat.reshape(N * W, 5 * C).astype(jnp.bfloat16)
    c_in = c_cl.reshape(N * W, C)

    h_cl_o, c_cl_o = pl.pallas_call(
        rowlstm_cell_kernel,
        out_shape=(
            jax.ShapeDtypeStruct((N * W, C), jnp.float32),
            jax.ShapeDtypeStruct((N * W, C), jnp.float32),
        ),
    )(xcat, params["w_cat"], params["bias"], c_in)

    def from_cl(v):                     # channel-last (N*W, C) -> torch-flat (N, C*W)
        return v.reshape(N, W, C).transpose(0, 2, 1).reshape(N, C * W)

    h = from_cl(h_cl_o)
    c = from_cl(c_cl_o)
    return h, (c, h)


# --------------------------------------------------------------------------------------
# pure-JAX reference of the PyTorch forward (matmul operands bf16-rounded to mirror the
# kernel's dtype policy; accumulation and all gate math in f32)
# --------------------------------------------------------------------------------------
def rowlstm_cell_ref(raw, inputs, states, hidden_dims, image_size):
    C, W = hidden_dims, image_size
    c_prev, h_prev = states
    N = inputs.shape[0]

    def q(a):
        return jnp.asarray(a, jnp.float32).astype(jnp.bfloat16).astype(jnp.float32)

    wi = np.asarray(raw["wi"], np.float32).copy()
    wi[:, :, 2:] = 0.0
    wi = q(wi)
    ws = q(np.asarray(raw["ws"], np.float32))
    bi = jnp.asarray(raw["bi"], jnp.float32)
    bs = jnp.asarray(raw["bs"], jnp.float32)

    def conv1d(v, w, b):                # v: (N, C, W), w: (4C, C, 3), padding = 1
        vp = jnp.pad(v, ((0, 0), (0, 0), (1, 1)))
        out = b[None, :, None]
        for k in range(3):
            out = out + jnp.einsum("ncw,oc->now", vp[:, :, k:k + W], w[:, :, k])
        return out

    i_s = conv1d(q(inputs).reshape(N, C, W), wi, bi)
    s_s = conv1d(q(h_prev).reshape(N, C, W), ws, bs)
    gates = jax.nn.sigmoid((i_s + s_s).reshape(N, 4 * C * W))
    nu = C * W
    i, g, f, o = gates[:, :nu], gates[:, nu:2 * nu], gates[:, 2 * nu:3 * nu], gates[:, 3 * nu:]
    c = f * c_prev + i * g
    h = o * jnp.tanh(c)
    return h, (c, h)


# --------------------------------------------------------------------------------------
if __name__ == "__main__":
    hidden_dims, image_size, batch = 16, 16, 2   # channel_in == hidden_dims (required by the module)
    num_units = hidden_dims * image_size

    key = jax.random.PRNGKey(0)
    k_par, k_x, k_c, k_h = jax.random.split(key, 4)

    raw = init_raw_params(k_par, hidden_dims)
    params = build_kernel_params(raw)

    inputs = jax.random.uniform(k_x, (batch, num_units), jnp.float32)
    c0 = 0.5 * jax.random.normal(k_c, (batch, num_units), jnp.float32)
    h0 = 0.5 * jax.random.normal(k_h, (batch, num_units), jnp.float32)

    fwd = jax.jit(functools.partial(rowlstm_cell_forward,
                                    hidden_dims=hidden_dims, image_size=image_size))
    h, (c, h_again) = fwd(params, inputs, (c0, h0))
    h, c = jax.block_until_ready((h, c))

    assert h.shape == (batch, num_units) and c.shape == (batch, num_units), (h.shape, c.shape)
    assert bool(jnp.all(jnp.isfinite(h))) and bool(jnp.all(jnp.isfinite(c)))

    h_ref, (c_ref, _) = rowlstm_cell_ref(raw, inputs, (c0, h0), hidden_dims, image_size)
    np.testing.assert_allclose(np.asarray(h), np.asarray(h_ref), atol=2e-3, rtol=2e-3)
    np.testing.assert_allclose(np.asarray(c), np.asarray(c_ref), atol=2e-3, rtol=2e-3)

    print("KERNEL_OK")
</pallas_src>

<mosaic_0001>
module attributes {stable_mosaic.version = 11 : i64} {
  func.func @rowlstm_cell_kernel(%arg0: memref<32x80xbf16, #tpu.memory_space<vmem>>, %arg1: memref<80x64xbf16, #tpu.memory_space<vmem>>, %arg2: memref<1x64xf32, #tpu.memory_space<vmem>>, %arg3: memref<32x16xf32, #tpu.memory_space<vmem>>, %arg4: memref<32x16xf32, #tpu.memory_space<vmem>>, %arg5: memref<32x16xf32, #tpu.memory_space<vmem>>) attributes {dimension_semantics = [], scalar_prefetch = 0 : i64, scratch_operands = 0 : i64, tpu.core_type = #tpu.core_type<tc>} {
    %c0 = arith.constant 0 : index
    %c0_0 = arith.constant 0 : index
    %0 = vector.load %arg0[%c0, %c0_0] : memref<32x80xbf16, #tpu.memory_space<vmem>>, vector<32x80xbf16>
    %c0_1 = arith.constant 0 : index
    %c0_2 = arith.constant 0 : index
    %1 = vector.load %arg1[%c0_1, %c0_2] : memref<80x64xbf16, #tpu.memory_space<vmem>>, vector<80x64xbf16>
    %cst = arith.constant dense<0.000000e+00> : vector<32x64xf32>
    %2 = tpu.matmul %0, %1, %cst {dimension_numbers = #tpu.dot_dimension_numbers<[1], [0], [0], [1], [0, 0, 1, 1], [], []>} : vector<32x80xbf16>, vector<80x64xbf16>, vector<32x64xf32> -> vector<32x64xf32>
    %c0_3 = arith.constant 0 : index
    %c0_4 = arith.constant 0 : index
    %3 = vector.load %arg2[%c0_3, %c0_4] : memref<1x64xf32, #tpu.memory_space<vmem>>, vector<1x64xf32>
    %4 = vector.broadcast %3 : vector<1x64xf32> to vector<32x64xf32>
    %5 = arith.addf %2, %4 : vector<32x64xf32>
    %6 = arith.negf %5 : vector<32x64xf32>
    %7 = math.exp %6 : vector<32x64xf32>
    %cst_5 = arith.constant 1.000000e+00 : f32
    %8 = vector.broadcast %cst_5 : f32 to vector<32x64xf32>
    %9 = arith.addf %8, %7 : vector<32x64xf32>
    %10 = arith.divf %8, %9 : vector<32x64xf32>
    %11 = vector.extract_strided_slice %10 {offsets = [0, 0], sizes = [32, 16], strides = [1, 1]} : vector<32x64xf32> to vector<32x16xf32>
    %12 = vector.extract_strided_slice %10 {offsets = [0, 16], sizes = [32, 16], strides = [1, 1]} : vector<32x64xf32> to vector<32x16xf32>
    %13 = vector.extract_strided_slice %10 {offsets = [0, 32], sizes = [32, 16], strides = [1, 1]} : vector<32x64xf32> to vector<32x16xf32>
    %14 = vector.extract_strided_slice %10 {offsets = [0, 48], sizes = [32, 16], strides = [1, 1]} : vector<32x64xf32> to vector<32x16xf32>
    %c0_6 = arith.constant 0 : index
    %c0_7 = arith.constant 0 : index
    %15 = vector.load %arg3[%c0_6, %c0_7] : memref<32x16xf32, #tpu.memory_space<vmem>>, vector<32x16xf32>
    %16 = arith.mulf %13, %15 : vector<32x16xf32>
    %17 = arith.mulf %11, %12 : vector<32x16xf32>
    %18 = arith.addf %16, %17 : vector<32x16xf32>
    %c0_8 = arith.constant 0 : index
    %c0_9 = arith.constant 0 : index
    %19 = vector.load %arg5[%c0_8, %c0_9] : memref<32x16xf32, #tpu.memory_space<vmem>>, vector<32x16xf32>
    tpu.vector_store %arg5[%c0_8, %c0_9], %18 {strides = array<i32>} : memref<32x16xf32, #tpu.memory_space<vmem>>, vector<32x16xf32>,
    %20 = math.tanh %18 : vector<32x16xf32>
    %21 = arith.mulf %14, %20 : vector<32x16xf32>
    %c0_10 = arith.constant 0 : index
    %c0_11 = arith.constant 0 : index
    %22 = vector.load %arg4[%c0_10, %c0_11] : memref<32x16xf32, #tpu.memory_space<vmem>>, vector<32x16xf32>
    tpu.vector_store %arg4[%c0_10, %c0_11], %21 {strides = array<i32>} : memref<32x16xf32, #tpu.memory_space<vmem>>, vector<32x16xf32>,
    return
  }
}

</mosaic_0001>

<bundles_post_ra>
// kernel: rowlstm_cell_forward.1
= control target key start
LH: loop header
LB: loop body
LE: loop exit
PB: predicated region body
PF: predicated region fallthrough
CT: control target
= control target key end

     0   :  { %vm81_vm0 = vcmask 654336   ;;  %s370_s11 = smov 32   ;;  %s372_s16 = smov 96   ;;  %vm241_vm1 = vcmask 130048   ;;  %s496_s1 = inlined_call_operand.vmem [shape: bf16[80,64], index: 1, kind: input, shape index: {}]   ;;  %s497_s0 = inlined_call_operand.vmem [shape: bf16[32,80], index: 0, kind: input, shape index: {}]   ;;  %s498_s2 = inlined_call_operand.vmem [shape: f32[1,64], index: 2, kind: input, shape index: {}]   ;;  %s499_s3 = inlined_call_operand.vmem [shape: f32[32,16], index: 3, kind: input, shape index: {}]   ;;  %s500_s5 = inlined_call_operand.vmem [shape: f32[32,16], index: 5, kind: output, shape index: {1}]   ;;  %s501_s4 = inlined_call_operand.vmem [shape: f32[32,16], index: 4, kind: output, shape index: {0}]  }
   0x1   :  { %v338_v0 = vld [vmem:[%s496_s1] sm:$0xff]   ;;  %v339_v1 = vld [vmem:[%s496_s1 + $0x8] sm:$0xff]   ;;  %v340_v2 = vld [vmem:[%s496_s1 + $0x10] sm:$0xff]   ;;  %s373_s17 = smov 80  }
   0x2   :  { %319 = vmatprep.subr.bf16.mxu0 %v338_v0  ;;  %v343_v3 = vld [vmem:[%s497_s0] sm:$0xff]   ;;  %v341_v4 = vld [vmem:[%s496_s1 + $0x18] sm:$0xff]   ;;  %v344_v6 = vld [vmem:[%s497_s0 + $0x8] sm:$0xff]   ;;  %s369_s0 = smov 112  }
   0x3   :  { %320 = vmatpush3.bf16.msra.mxu0 %v338_v0  ;;  %329 = vmatprep.mubr.msk.bf16.mxu0 %vm81_vm0, %v343_v3  ;;  %v342_v5 = vld [vmem:[%s496_s1 + $0x20] sm:$0xff]   ;;  %v162_v32 = vld [vmem:[%s499_s3 + $0x8] sm:$0xff]  ;;  %v164_v34 = vld [vmem:[%s499_s3 + $0x18] sm:$0xff] }
   0x4   :  { %321 = vmatprep.subr.bf16.mxu0 %v339_v1  ;;  %v298_v7 = vld [vmem:[%s498_s2] ss:$0 sm:$0xff]  ;;  %v163_v35 = vld [vmem:[%s499_s3 + $0x10] sm:$0xff] }
   0x5   :  { %v161_v33 = vld [vmem:[%s499_s3] sm:$0xff]  ;;  %s371_s3 = smov 16  }
   0x7   :  { %322 = vmatpush3.bf16.msra.mxu0 %v339_v1 }
   0x8   :  { %323 = vmatprep.subr.bf16.mxu0 %v340_v2 }
   0xb   :  { %324 = vmatpush3.bf16.msra.mxu0 %v340_v2 }
   0xc   :  { %325 = vmatprep.subr.bf16.mxu0 %v341_v4 }
   0xf   :  { %326 = vmatpush3.bf16.msra.mxu0 %v341_v4 }
  0x10   :  { %327 = vmatprep.subr.bf16.mxu0 %v342_v5 }
  0x13   :  { %328 = vmatpush3.bf16.msra.mxu0 %v342_v5 }
  0x16   :  { %330 = vmatmul.mubr.msk.bf16.vlgmr.msra.gmra.mrb[0].mxu0 %vm81_vm0, %v344_v6 }
  0xe9   :  { %v331_v8 = vpop.f32.mrb[0].mxu0 }
  0xea   :  { %v131_v9 = vadd.f32 %v331_v8, %v298_v7  ;;  %v122_v10 = vpop.f32.mrb[1].mxu0 }
  0xeb   :  { %v123_v11 = vadd.f32 %v298_v7, %v122_v10  ;;  %v332_v12 = vpop.f32.mrb[2].mxu0 }
  0xec   :  { %v310_v13 = vmul.f32 -1.442695, %v131_v9  ;;  %v134_v14 = vadd.f32 %v332_v12, %v298_v7  ;;  %v125_v15 = vpop.f32.mrb[3].mxu0 }
  0xed   :  { %v308_v16 = vmul.f32 -1.442695, %v123_v11  ;;  %v126_v17 = vadd.f32 %v298_v7, %v125_v15 }
  0xee   :  { %345 = vpow2.f32 %v310_v13  ;;  %v311_v18 = vmul.f32 -1.442695, %v134_v14 }
  0xef   :  { %347 = vpow2.f32 %v308_v16  ;;  %v309_v19 = vmul.f32 -1.442695, %v126_v17 }
  0xf0   :  { %349 = vpow2.f32 %v311_v18 }
  0xf1   :  { %351 = vpow2.f32 %v309_v19 }
  0xf8   :  { %v346_v20 = vpop.eup %345 }
  0xf9   :  { %v348_v21 = vpop.eup %347  ;;  %v151_v22 = vadd.f32 1.0, %v346_v20 }
  0xfa   :  { %v350_v23 = vpop.eup %349  ;;  %v149_v24 = vadd.f32 1.0, %v348_v21 }
  0xfb   :  { %v352_v25 = vpop.eup %351  ;;  %353 = vrcp.f32 %v151_v22  ;;  %v152_v26 = vadd.f32 1.0, %v350_v23 }
  0xfc   :  { %355 = vrcp.f32 %v149_v24  ;;  %v150_v27 = vadd.f32 1.0, %v352_v25 }
  0xfd   :  { %357 = vrcp.f32 %v152_v26 }
  0xfe   :  { %359 = vrcp.f32 %v150_v27 }
 0x105   :  { %v428_v28 = vpop.eup %353 }
 0x106   :  { %v430_v29 = vpop.eup %355  ;;  %193 = vrot.lane.b32.xlu1 %v428_v28, %s369_s0 }
 0x107   :  { %189 = vrot.lane.b32.xlu0 %v430_v29, %s369_s0  ;;  %v434_v30 = vpop.eup %357 }
 0x108   :  { %v436_v31 = vpop.eup %359 }
 0x10a   :  { %195 = vrot.lane.b32.xlu1 %v434_v30, %s369_s0 }
 0x10b   :  { %191 = vrot.lane.b32.xlu0 %v436_v31, %s369_s0 }
 0x10e   :  { %171 = vrot.lane.b32.xlu1 %v162_v32, %s370_s11 }
 0x10f   :  { %169 = vrot.lane.b32.xlu0 %v161_v33, %s370_s11 }
 0x112   :  { %175 = vrot.lane.b32.xlu1 %v164_v34, %s370_s11 }
 0x113   :  { %173 = vrot.lane.b32.xlu0 %v163_v35, %s370_s11 }
 0x178   :  { %v194_v36 = vpop.permute.xlu1 %193 }
 0x179   :  { %v190_v37 = vpop.permute.xlu0 %189  ;;  %v203_v40 = vmul.f32 %v428_v28, %v194_v36 }
 0x17a   :  { %v201_v38 = vmul.f32 %v430_v29, %v190_v37 }
 0x17c   :  { %209 = vrot.lane.b32.xlu0 %v201_v38, %s370_s11  ;;  %v196_v42 = vpop.permute.xlu1 %195 }
 0x17d   :  { %v192_v39 = vpop.permute.xlu0 %191  ;;  %v204_v43 = vmul.f32 %v434_v30, %v196_v42 }
 0x17e   :  { %v202_v41 = vmul.f32 %v436_v31, %v192_v39 }
 0x180   :  { %213 = vrot.lane.b32.xlu0 %v203_v40, %s370_s11  ;;  %211 = vrot.lane.b32.xlu1 %v202_v41, %s370_s11  ;;  %v172_v45 = vpop.permute.xlu1 %171 }
 0x181   :  { %v170_v44 = vpop.permute.xlu0 %169  ;;  %v182_v51 = vmul.f32 %v436_v31, %v172_v45 }
 0x182   :  { %v181_v47 = vmul.f32 %v430_v29, %v170_v44 }
 0x184   :  { %215 = vrot.lane.b32.xlu1 %v204_v43, %s370_s11  ;;  %v176_v48 = vpop.permute.xlu1 %175 }
 0x185   :  { %v174_v46 = vpop.permute.xlu0 %173  ;;  %v184_v57 = vmul.f32 %v434_v30, %v176_v48 }
 0x186   :  { %v183_v52 = vmul.f32 %v428_v28, %v174_v46 }
 0x1ee   :  { %v210_v49 = vpop.permute.xlu0 %209 }
 0x1ef   :  { %v221_v50 = vadd.f32 %v210_v49, %v181_v47 }
 0x1f1   :  { %361 = vtanh.f32 %v221_v50 }
 0x1f2   :  { %v212_v53 = vpop.permute.xlu1 %211  ;;  %v214_v54 = vpop.permute.xlu0 %213 }
 0x1f3   :  { %v222_v55 = vadd.f32 %v212_v53, %v182_v51  ;;  %v223_v56 = vadd.f32 %v214_v54, %v183_v52 }
 0x1f5   :  { %363 = vtanh.f32 %v222_v55 }
 0x1f6   :  { %365 = vtanh.f32 %v223_v56  ;;  %v216_v58 = vpop.permute.xlu1 %215 }
 0x1f7   :  { %v224_v59 = vadd.f32 %v216_v58, %v184_v57 }
 0x1f9   :  { %367 = vtanh.f32 %v224_v59 }
 0x1fb   :  { %v362_v60 = vpop.eup %361 }
 0x1fc   :  { %254 = vrot.lane.b32.xlu0 %v362_v60, %s371_s3 }
 0x1ff   :  { %v364_v61 = vpop.eup %363 }
 0x200   :  { %v366_v62 = vpop.eup %365  ;;  %256 = vrot.lane.b32.xlu1 %v364_v61, %s371_s3 }
 0x201   :  { %258 = vrot.lane.b32.xlu0 %v366_v62, %s371_s3 }
 0x203   :  { %v368_v63 = vpop.eup %367 }
 0x204   :  { %260 = vrot.lane.b32.xlu1 %v368_v63, %s371_s3 }
 0x205   :  { %229 = vrot.lane.b32.xlu0 %v221_v50, %s372_s16 }
 0x208   :  { %231 = vrot.lane.b32.xlu1 %v222_v55, %s372_s16 }
 0x209   :  { %233 = vrot.lane.b32.xlu0 %v223_v56, %s372_s16 }
 0x20c   :  { %235 = vrot.lane.b32.xlu1 %v224_v59, %s372_s16 }
 0x26e   :  { %v255_v0 = vpop.permute.xlu0 %254 }
 0x26f   :  { %v266_v1 = vmul.f32 %v430_v29, %v255_v0 }
 0x271   :  { %274 = vrot.lane.b32.xlu0 %v266_v1, %s373_s17 }
 0x272   :  { %v257_v2 = vpop.permute.xlu1 %256 }
 0x273   :  { %v267_v3 = vmul.f32 %v436_v31, %v257_v2  ;;  %v259_v4 = vpop.permute.xlu0 %258 }
 0x274   :  { %v268_v5 = vmul.f32 %v428_v28, %v259_v4 }
 0x275   :  { %276 = vrot.lane.b32.xlu1 %v267_v3, %s373_s17 }
 0x276   :  { %278 = vrot.lane.b32.xlu0 %v268_v5, %s373_s17  ;;  %v261_v6 = vpop.permute.xlu1 %260 }
 0x277   :  { %v269_v7 = vmul.f32 %v434_v30, %v261_v6  ;;  %v230_v8 = vpop.permute.xlu0 %229 }
 0x278   :  { %242 = vst.msk [vmem:[%s500_s5] sm:$0xff] %vm241_vm1, %v230_v8 }
 0x279   :  { %280 = vrot.lane.b32.xlu1 %v269_v7, %s373_s17 }
 0x27a   :  { %v232_v9 = vpop.permute.xlu1 %231 }
 0x27b   :  { %243 = vst.msk [vmem:[%s500_s5 + $0x8] sm:$0xff] %vm241_vm1, %v232_v9  ;;  %v234_v10 = vpop.permute.xlu0 %233 }
 0x27c   :  { %244 = vst.msk [vmem:[%s500_s5 + $0x10] sm:$0xff] %vm241_vm1, %v234_v10 }
 0x27e   :  { %v236_v11 = vpop.permute.xlu1 %235 }
 0x27f   :  { %245 = vst.msk [vmem:[%s500_s5 + $0x18] sm:$0xff] %vm241_vm1, %v236_v11 }
 0x2e3   :  { %v275_v12 = vpop.permute.xlu0 %274 }
 0x2e4   :  { %286 = vst.msk [vmem:[%s501_s4] sm:$0xff] %vm241_vm1, %v275_v12 }
 0x2e7   :  { %v277_v13 = vpop.permute.xlu1 %276 }
 0x2e8   :  { %287 = vst.msk [vmem:[%s501_s4 + $0x8] sm:$0xff] %vm241_vm1, %v277_v13  ;;  %v279_v14 = vpop.permute.xlu0 %278 }
 0x2e9   :  { %288 = vst.msk [vmem:[%s501_s4 + $0x10] sm:$0xff] %vm241_vm1, %v279_v14 }
 0x2eb   :  { %v281_v15 = vpop.permute.xlu1 %280 }
 0x2ec   :  { %289 = vst.msk [vmem:[%s501_s4 + $0x18] sm:$0xff] %vm241_vm1, %v281_v15 }

</bundles_post_ra>
